<compile_context>
chip_gen: v7x
topology: tpu7x:2x2x1
jax: 0.10.0
libtpu: 0.0.40
codegen_flags: <defaults>
</compile_context>

<pallas_src>
import functools
import math

import jax
import jax.numpy as jnp
from jax.experimental import pallas as pl
from jax.experimental.pallas import tpu as pltpu


def _round_up(x, m):
    return (x + m - 1) // m * m


def _masklm_kernel(feat_ref, wd_ref, bd_ref, g_ref, beta_ref, wv_ref, bv_ref,
                   out_ref, h_ref, *, e_true):
    """Grid = (token tile i, vocab tile j). h_ref caches the normalized hidden."""

    @pl.when(pl.program_id(1) == 0)
    def _compute_hidden():
        # ---- dense: Linear(E, E); bf16 inputs, f32 accumulation ----
        h = jnp.dot(feat_ref[...], wd_ref[...],
                    preferred_element_type=jnp.float32)
        h = h + bd_ref[...]

        # ---- activation: exact GELU (erf form, torch F.gelu default) ----
        h = 0.5 * h * (1.0 + jax.lax.erf(h * jnp.float32(1.0 / math.sqrt(2.0))))

        # ---- LayerNorm over the TRUE embed dim (eps=1e-5, affine) ----
        # Padded embed columns of h are exactly zero (zero-padded weights/bias),
        # so sums over the padded width equal sums over the true width.
        e_pad = h.shape[-1]
        inv_e = jnp.float32(1.0 / e_true)
        mu = jnp.sum(h, axis=-1, keepdims=True) * inv_e
        d = h - mu
        if e_true != e_pad:
            col = jax.lax.broadcasted_iota(jnp.int32, h.shape, 1)
            d = jnp.where(col < e_true, d, 0.0)
        var = jnp.sum(d * d, axis=-1, keepdims=True) * inv_e
        hn = d * jax.lax.rsqrt(var + jnp.float32(1e-5))
        hn = hn * g_ref[...] + beta_ref[...]

        h_ref[...] = hn.astype(h_ref.dtype)

    # ---- output projection for this vocab tile (MXU, f32 accumulate) ----
    y = jnp.dot(h_ref[...], wv_ref[...], preferred_element_type=jnp.float32)
    y = y + bv_ref[...]
    out_ref[...] = y.astype(out_ref.dtype)


def prepare_params(params, *, vocab_tile=512, compute_dtype=jnp.bfloat16):
    """Pre-transpose / pad / cast the weights once (call outside the step fn)."""
    E = params["dense_w"].shape[0]
    V = params["vocab_w"].shape[0]
    Ep = _round_up(E, 128)
    tv = min(_round_up(vocab_tile, 128), _round_up(V, 128))
    Vp = _round_up(V, tv)

    def pad_to(x, shape, dtype):
        out = jnp.zeros(shape, dtype)
        return out.at[tuple(slice(0, s) for s in x.shape)].set(x.astype(dtype))

    return {
        "wd": pad_to(params["dense_w"].T, (Ep, Ep), compute_dtype),       # (E,E) -> (in,out)
        "bd": pad_to(params["dense_b"].reshape(1, E), (1, Ep), jnp.float32),
        "gamma": pad_to(params["ln_gamma"].reshape(1, E), (1, Ep), jnp.float32),
        "beta": pad_to(params["ln_beta"].reshape(1, E), (1, Ep), jnp.float32),
        "wv": pad_to(params["vocab_w"].T, (Ep, Vp), compute_dtype),       # (V,E) -> (in,out)
        "bv": pad_to(params["out_bias"].reshape(1, V), (1, Vp), jnp.float32),
        "embed_dim": E,
        "embed_pad": Ep,
        "vocab": V,
        "vocab_pad": Vp,
        "vocab_tile": tv,
        "compute_dtype": compute_dtype,
    }


def masklm_head_pallas(features, prepped, *, token_tile=256, out_dtype=None):
    """features: [..., E].  Returns logits [..., V]."""
    E = prepped["embed_dim"]
    Ep = prepped["embed_pad"]
    V = prepped["vocab"]
    Vp = prepped["vocab_pad"]
    tv = prepped["vocab_tile"]
    cdt = prepped["compute_dtype"]
    out_dtype = features.dtype if out_dtype is None else out_dtype

    orig_shape = features.shape
    assert orig_shape[-1] == E, (orig_shape, E)
    feats = features.reshape(-1, E).astype(cdt)
    N = feats.shape[0]

    # Token tile: as large as requested, clamped to the (padded) token count,
    # aligned to the sublane packing of the compute dtype.
    row_align = 8 * (4 // jnp.dtype(cdt).itemsize)
    tm = _round_up(min(token_tile, _round_up(N, row_align)), row_align)
    Np = _round_up(N, tm)
    feats = jnp.pad(feats, ((0, Np - N), (0, Ep - E)))

    grid = (Np // tm, Vp // tv)

    # VMEM footprint: double-buffered pipeline blocks + hidden scratch.
    csz = jnp.dtype(cdt).itemsize
    osz = jnp.dtype(out_dtype).itemsize
    foot = 2 * (tm * Ep * csz + Ep * Ep * csz + 3 * Ep * 4
                + Ep * tv * csz + tv * 4 + tm * tv * osz) + tm * Ep * csz
    vmem_limit = int(min(max(2 * foot, 32 * 1024 * 1024), 60 * 1024 * 1024))

    cost = pl.CostEstimate(
        flops=2 * Np * Ep * Ep + 2 * Np * Ep * Vp,
        transcendentals=Np * Ep,
        bytes_accessed=(Np * Ep * csz + Ep * Ep * csz + Ep * Vp * csz
                        + Np * Vp * osz + (3 * Ep + Vp) * 4),
    )

    out = pl.pallas_call(
        functools.partial(_masklm_kernel, e_true=E),
        out_shape=jax.ShapeDtypeStruct((Np, Vp), out_dtype),
        grid_spec=pltpu.PrefetchScalarGridSpec(
            num_scalar_prefetch=0,
            grid=grid,
            in_specs=[
                pl.BlockSpec((tm, Ep), lambda i, j: (i, 0)),   # features tile
                pl.BlockSpec((Ep, Ep), lambda i, j: (0, 0)),   # dense weight
                pl.BlockSpec((1, Ep), lambda i, j: (0, 0)),    # dense bias
                pl.BlockSpec((1, Ep), lambda i, j: (0, 0)),    # ln gamma
                pl.BlockSpec((1, Ep), lambda i, j: (0, 0)),    # ln beta
                pl.BlockSpec((Ep, tv), lambda i, j: (0, j)),   # vocab weight tile
                pl.BlockSpec((1, tv), lambda i, j: (0, j)),    # output bias tile
            ],
            out_specs=pl.BlockSpec((tm, tv), lambda i, j: (i, j)),
            scratch_shapes=[pltpu.VMEM((tm, Ep), cdt)],        # cached hidden
        ),
        compiler_params=pltpu.CompilerParams(
            dimension_semantics=("parallel", "arbitrary"),
            vmem_limit_bytes=vmem_limit,
        ),
        cost_estimate=cost,
    )(feats, prepped["wd"], prepped["bd"], prepped["gamma"], prepped["beta"],
      prepped["wv"], prepped["bv"])

    out = out[:N, :V]
    return out.reshape(*orig_shape[:-1], V)


# ----------------------------- references -----------------------------------

def _reference_f32(features, params):
    E = features.shape[-1]
    x = features.reshape(-1, E).astype(jnp.float32)
    h = x @ params["dense_w"].T + params["dense_b"]
    h = 0.5 * h * (1.0 + jax.lax.erf(h / jnp.sqrt(2.0)))
    mu = jnp.mean(h, axis=-1, keepdims=True)
    var = jnp.mean((h - mu) ** 2, axis=-1, keepdims=True)
    h = (h - mu) / jnp.sqrt(var + 1e-5)
    h = h * params["ln_gamma"] + params["ln_beta"]
    y = h @ params["vocab_w"].T + params["out_bias"]
    return y.reshape(*features.shape[:-1], -1)


def _reference_matched(features, params, compute_dtype):
    """Reference with the same precision strategy as the kernel (bf16 matmul
    inputs, f32 accumulation and elementwise math)."""
    E = features.shape[-1]
    x = features.reshape(-1, E).astype(compute_dtype)
    h = jnp.dot(x, params["dense_w"].T.astype(compute_dtype),
                preferred_element_type=jnp.float32)
    h = h + params["dense_b"]
    h = 0.5 * h * (1.0 + jax.lax.erf(h * jnp.float32(1.0 / math.sqrt(2.0))))
    mu = jnp.mean(h, axis=-1, keepdims=True)
    var = jnp.mean((h - mu) ** 2, axis=-1, keepdims=True)
    h = (h - mu) * jax.lax.rsqrt(var + jnp.float32(1e-5))
    h = h * params["ln_gamma"] + params["ln_beta"]
    h = h.astype(compute_dtype)
    y = jnp.dot(h, params["vocab_w"].T.astype(compute_dtype),
                preferred_element_type=jnp.float32)
    y = y + params["out_bias"]
    return y.reshape(*features.shape[:-1], -1)


def make_params(key, embed_dim, output_dim):
    k1, k2, k3 = jax.random.split(key, 3)
    scale_d = 1.0 / math.sqrt(embed_dim)
    return {
        # nn.Linear(embed_dim, embed_dim): weight (out,in), bias (out,)
        "dense_w": jax.random.uniform(k1, (embed_dim, embed_dim),
                                      minval=-scale_d, maxval=scale_d,
                                      dtype=jnp.float32),
        "dense_b": jax.random.uniform(k2, (embed_dim,),
                                      minval=-scale_d, maxval=scale_d,
                                      dtype=jnp.float32),
        # LayerNorm affine params
        "ln_gamma": jnp.ones((embed_dim,), jnp.float32),
        "ln_beta": jnp.zeros((embed_dim,), jnp.float32),
        # nn.Linear(embed_dim, output_dim, bias=False).weight: (out,in)
        "vocab_w": jax.random.uniform(k3, (output_dim, embed_dim),
                                      minval=-scale_d, maxval=scale_d,
                                      dtype=jnp.float32),
        # self.bias = nn.Parameter(torch.zeros(output_dim))
        "out_bias": jnp.zeros((output_dim,), jnp.float32),
    }


if __name__ == "__main__":
    B, T, E, V = 2, 8, 32, 64
    key = jax.random.PRNGKey(0)
    pkey, fkey = jax.random.split(key)
    params = make_params(pkey, E, V)
    features = jax.random.normal(fkey, (B, T, E), dtype=jnp.float32)

    prepped = prepare_params(params)                 # one-time weight prep
    out = masklm_head_pallas(features, prepped)
    out = jax.block_until_ready(out)

    ref_matched = _reference_matched(features, params, prepped["compute_dtype"])
    ref_f32 = _reference_f32(features, params)

    out_f32 = out.astype(jnp.float32)
    assert out.shape == (B, T, V), out.shape
    assert jnp.allclose(out_f32, ref_matched, atol=1e-2, rtol=1e-2), \
        float(jnp.max(jnp.abs(out_f32 - ref_matched)))
    assert jnp.allclose(out_f32, ref_f32, atol=1e-1, rtol=1e-1), \
        float(jnp.max(jnp.abs(out_f32 - ref_f32)))

    print("KERNEL_OK")
</pallas_src>

<mosaic_0001>
module attributes {stable_mosaic.version = 11 : i64} {
  func.func @_masklm_kernel(%arg0: i32, %arg1: i32, %arg2: memref<16x128xbf16, #tpu.memory_space<vmem>>, %arg3: memref<128x128xbf16, #tpu.memory_space<vmem>>, %arg4: memref<1x128xf32, #tpu.memory_space<vmem>>, %arg5: memref<1x128xf32, #tpu.memory_space<vmem>>, %arg6: memref<1x128xf32, #tpu.memory_space<vmem>>, %arg7: memref<128x128xbf16, #tpu.memory_space<vmem>>, %arg8: memref<1x128xf32, #tpu.memory_space<vmem>>, %arg9: memref<16x128xf32, #tpu.memory_space<vmem>>, %arg10: memref<16x128xbf16, #tpu.memory_space<vmem>>) attributes {dimension_semantics = [#tpu.dimension_semantics<parallel>, #tpu.dimension_semantics<arbitrary>], iteration_bounds = array<i64: 1, 1>, scalar_prefetch = 0 : i64, scratch_operands = 1 : i64, tpu.core_type = #tpu.core_type<tc>, window_params = [{transform_indices = @transform_0, window_bounds = array<i64: 16, 128>}, {pipeline_mode = #tpu.pipeline_mode<synchronous>, transform_indices = @transform_1, window_bounds = array<i64: 128, 128>}, {pipeline_mode = #tpu.pipeline_mode<synchronous>, transform_indices = @transform_2, window_bounds = array<i64: 1, 128>}, {pipeline_mode = #tpu.pipeline_mode<synchronous>, transform_indices = @transform_3, window_bounds = array<i64: 1, 128>}, {pipeline_mode = #tpu.pipeline_mode<synchronous>, transform_indices = @transform_4, window_bounds = array<i64: 1, 128>}, {transform_indices = @transform_5, window_bounds = array<i64: 128, 128>}, {transform_indices = @transform_6, window_bounds = array<i64: 1, 128>}, {transform_indices = @transform_7, window_bounds = array<i64: 16, 128>}]} {
    %c0_i32 = arith.constant 0 : i32
    %0 = arith.cmpi eq, %arg1, %c0_i32 : i32
    %1 = arith.extui %0 : i1 to i32
    %c0_i32_0 = arith.constant 0 : i32
    %2 = arith.cmpi ne, %1, %c0_i32_0 : i32
    scf.if %2 {
      %c0_8 = arith.constant 0 : index
      %c0_9 = arith.constant 0 : index
      %10 = vector.load %arg2[%c0_8, %c0_9] : memref<16x128xbf16, #tpu.memory_space<vmem>>, vector<16x128xbf16>
      %c0_10 = arith.constant 0 : index
      %c0_11 = arith.constant 0 : index
      %11 = vector.load %arg3[%c0_10, %c0_11] : memref<128x128xbf16, #tpu.memory_space<vmem>>, vector<128x128xbf16>
      %cst_12 = arith.constant dense<0.000000e+00> : vector<16x128xf32>
      %12 = tpu.matmul %10, %11, %cst_12 {dimension_numbers = #tpu.dot_dimension_numbers<[1], [0], [0], [1], [0, 0, 1, 1], [], []>} : vector<16x128xbf16>, vector<128x128xbf16>, vector<16x128xf32> -> vector<16x128xf32>
      %c0_13 = arith.constant 0 : index
      %c0_14 = arith.constant 0 : index
      %13 = vector.load %arg4[%c0_13, %c0_14] : memref<1x128xf32, #tpu.memory_space<vmem>>, vector<1x128xf32>
      %14 = vector.broadcast %13 : vector<1x128xf32> to vector<16x128xf32>
      %15 = arith.addf %12, %14 : vector<16x128xf32>
      %cst_15 = arith.constant 5.000000e-01 : f32
      %16 = vector.broadcast %cst_15 : f32 to vector<16x128xf32>
      %17 = arith.mulf %16, %15 : vector<16x128xf32>
      %cst_16 = arith.constant 0.707106769 : f32
      %18 = vector.broadcast %cst_16 : f32 to vector<16x128xf32>
      %19 = arith.mulf %15, %18 : vector<16x128xf32>
      %20 = math.erf %19 : vector<16x128xf32>
      %cst_17 = arith.constant 1.000000e+00 : f32
      %21 = vector.broadcast %cst_17 : f32 to vector<16x128xf32>
      %22 = arith.addf %21, %20 : vector<16x128xf32>
      %23 = arith.mulf %17, %22 : vector<16x128xf32>
      %cst_18 = arith.constant dense<0.000000e+00> : vector<16xf32>
      %24 = vector.multi_reduction <add>, %23, %cst_18 [1] : vector<16x128xf32> to vector<16xf32>
      %25 = vector.shape_cast %24 : vector<16xf32> to vector<16x1xf32>
      %cst_19 = arith.constant 3.125000e-02 : f32
      %26 = vector.broadcast %cst_19 : f32 to vector<16x1xf32>
      %27 = arith.mulf %25, %26 : vector<16x1xf32>
      %28 = vector.broadcast %27 : vector<16x1xf32> to vector<16x128xf32>
      %29 = arith.subf %23, %28 : vector<16x128xf32>
      %30 = tpu.iota {dimensions = array<i32: 1>} : vector<16x128xi32>
      %c32_i32 = arith.constant 32 : i32
      %31 = vector.broadcast %c32_i32 : i32 to vector<16x128xi32>
      %32 = arith.cmpi slt, %30, %31 : vector<16x128xi32>
      %cst_20 = arith.constant 0.000000e+00 : f32
      %33 = vector.broadcast %cst_20 : f32 to vector<16x128xf32>
      %34 = arith.select %32, %29, %33 : vector<16x128xi1>, vector<16x128xf32>
      %35 = arith.mulf %34, %34 : vector<16x128xf32>
      %cst_21 = arith.constant dense<0.000000e+00> : vector<16xf32>
      %36 = vector.multi_reduction <add>, %35, %cst_21 [1] : vector<16x128xf32> to vector<16xf32>
      %37 = vector.shape_cast %36 : vector<16xf32> to vector<16x1xf32>
      %cst_22 = arith.constant 3.125000e-02 : f32
      %38 = vector.broadcast %cst_22 : f32 to vector<16x1xf32>
      %39 = arith.mulf %37, %38 : vector<16x1xf32>
      %cst_23 = arith.constant 9.99999974E-6 : f32
      %40 = vector.broadcast %cst_23 : f32 to vector<16x1xf32>
      %41 = arith.addf %39, %40 : vector<16x1xf32>
      %42 = math.rsqrt %41 : vector<16x1xf32>
      %43 = vector.broadcast %42 : vector<16x1xf32> to vector<16x128xf32>
      %44 = arith.mulf %34, %43 : vector<16x128xf32>
      %c0_24 = arith.constant 0 : index
      %c0_25 = arith.constant 0 : index
      %45 = vector.load %arg5[%c0_24, %c0_25] : memref<1x128xf32, #tpu.memory_space<vmem>>, vector<1x128xf32>
      %46 = vector.broadcast %45 : vector<1x128xf32> to vector<16x128xf32>
      %47 = arith.mulf %44, %46 : vector<16x128xf32>
      %c0_26 = arith.constant 0 : index
      %c0_27 = arith.constant 0 : index
      %48 = vector.load %arg6[%c0_26, %c0_27] : memref<1x128xf32, #tpu.memory_space<vmem>>, vector<1x128xf32>
      %49 = vector.broadcast %48 : vector<1x128xf32> to vector<16x128xf32>
      %50 = arith.addf %47, %49 : vector<16x128xf32>
      %51 = arith.truncf %50 : vector<16x128xf32> to vector<16x128xbf16>
      %c0_28 = arith.constant 0 : index
      %c0_29 = arith.constant 0 : index
      %52 = vector.load %arg10[%c0_28, %c0_29] : memref<16x128xbf16, #tpu.memory_space<vmem>>, vector<16x128xbf16>
      tpu.vector_store %arg10[%c0_28, %c0_29], %51 {strides = array<i32>} : memref<16x128xbf16, #tpu.memory_space<vmem>>, vector<16x128xbf16>,
    } else {
    }
    %c0 = arith.constant 0 : index
    %c0_1 = arith.constant 0 : index
    %3 = vector.load %arg10[%c0, %c0_1] : memref<16x128xbf16, #tpu.memory_space<vmem>>, vector<16x128xbf16>
    %c0_2 = arith.constant 0 : index
    %c0_3 = arith.constant 0 : index
    %4 = vector.load %arg7[%c0_2, %c0_3] : memref<128x128xbf16, #tpu.memory_space<vmem>>, vector<128x128xbf16>
    %cst = arith.constant dense<0.000000e+00> : vector<16x128xf32>
    %5 = tpu.matmul %3, %4, %cst {dimension_numbers = #tpu.dot_dimension_numbers<[1], [0], [0], [1], [0, 0, 1, 1], [], []>} : vector<16x128xbf16>, vector<128x128xbf16>, vector<16x128xf32> -> vector<16x128xf32>
    %c0_4 = arith.constant 0 : index
    %c0_5 = arith.constant 0 : index
    %6 = vector.load %arg8[%c0_4, %c0_5] : memref<1x128xf32, #tpu.memory_space<vmem>>, vector<1x128xf32>
    %7 = vector.broadcast %6 : vector<1x128xf32> to vector<16x128xf32>
    %8 = arith.addf %5, %7 : vector<16x128xf32>
    %c0_6 = arith.constant 0 : index
    %c0_7 = arith.constant 0 : index
    %9 = vector.load %arg9[%c0_6, %c0_7] : memref<16x128xf32, #tpu.memory_space<vmem>>, vector<16x128xf32>
    tpu.vector_store %arg9[%c0_6, %c0_7], %8 {strides = array<i32>} : memref<16x128xf32, #tpu.memory_space<vmem>>, vector<16x128xf32>,
    return
  }
  func.func @transform_0(%arg0: i32, %arg1: i32) -> (i32, i32) {
    %c0_i32 = arith.constant 0 : i32
    %c0_i32_0 = arith.constant 0 : i32
    return %arg0, %c0_i32 : i32, i32
  }
  func.func @transform_1(%arg0: i32, %arg1: i32) -> (i32, i32) {
    %c0_i32 = arith.constant 0 : i32
    %c0_i32_0 = arith.constant 0 : i32
    %c0_i32_1 = arith.constant 0 : i32
    return %c0_i32, %c0_i32_0 : i32, i32
  }
  func.func @transform_2(%arg0: i32, %arg1: i32) -> (i32, i32) {
    %c0_i32 = arith.constant 0 : i32
    %c0_i32_0 = arith.constant 0 : i32
    %c0_i32_1 = arith.constant 0 : i32
    return %c0_i32, %c0_i32_0 : i32, i32
  }
  func.func @transform_3(%arg0: i32, %arg1: i32) -> (i32, i32) {
    %c0_i32 = arith.constant 0 : i32
    %c0_i32_0 = arith.constant 0 : i32
    %c0_i32_1 = arith.constant 0 : i32
    return %c0_i32, %c0_i32_0 : i32, i32
  }
  func.func @transform_4(%arg0: i32, %arg1: i32) -> (i32, i32) {
    %c0_i32 = arith.constant 0 : i32
    %c0_i32_0 = arith.constant 0 : i32
    %c0_i32_1 = arith.constant 0 : i32
    return %c0_i32, %c0_i32_0 : i32, i32
  }
  func.func @transform_5(%arg0: i32, %arg1: i32) -> (i32, i32) {
    %c0_i32 = arith.constant 0 : i32
    %c0_i32_0 = arith.constant 0 : i32
    return %c0_i32, %arg1 : i32, i32
  }
  func.func @transform_6(%arg0: i32, %arg1: i32) -> (i32, i32) {
    %c0_i32 = arith.constant 0 : i32
    %c0_i32_0 = arith.constant 0 : i32
    return %c0_i32, %arg1 : i32, i32
  }
  func.func @transform_7(%arg0: i32, %arg1: i32) -> (i32, i32) {
    %c0_i32 = arith.constant 0 : i32
    return %arg0, %arg1 : i32, i32
  }
}

</mosaic_0001>

<bundles_post_ra>
// kernel: tpu_custom_call.1
= control target key start
LH: loop header
LB: loop body
LE: loop exit
PB: predicated region body
PF: predicated region fallthrough
CT: control target
= control target key end

     0   :  { %12 = vsyncpa [#allocation4], 0  ;;  %s735_s0 = inlined_call_operand.hbm [shape: bf16[16,128], index: 0, kind: input, shape index: {}]   ;;  %s736_s1 = inlined_call_operand.hbm [shape: bf16[128,128], index: 1, kind: input, shape index: {}]   ;;  %s737_s2 = inlined_call_operand.vmem [shape: f32[1,128], index: 2, kind: input, shape index: {}]   ;;  %s738_s3 = inlined_call_operand.vmem [shape: f32[1,128], index: 3, kind: input, shape index: {}]   ;;  %s739_s4 = inlined_call_operand.vmem [shape: f32[1,128], index: 4, kind: input, shape index: {}]   ;;  %s740_s5 = inlined_call_operand.hbm [shape: bf16[128,128], index: 5, kind: input, shape index: {}]   ;;  %s741_s6 = inlined_call_operand.vmem [shape: f32[1,128], index: 6, kind: input, shape index: {}]   ;;  %s742_s7 = inlined_call_operand.hbm [shape: f32[16,128], index: 7, kind: output, shape index: {}]  }
   0x1   :  { %13 = vsyncpa [#allocation7], 0 }
   0x2   :  { %14 = vsyncpa [#allocation5], 0  ;;  %s591_s24 = smov [#allocation6]   ;;  %s592_s26 = smov [#allocation3]  }
   0x3   :  { %s32_s25 = sshll.u32 %s591_s24, 4  ;;  %s20_s27 = sshll.u32 %s592_s26, 4  ;;  %s33_s25 = int_to_ptr.vmem [resolvable:$true] %s32_s25  ;;  %s641_s27 = int_to_ptr.vmem [resolvable:$true] %s20_s27 }
   0x4   :  { %s497_s30 = scalar_lea.hbm %s736_s1, 1024 }
   0x5   :  { %p498_p0 = scmp.ne.s32.totalorder %s736_s1, %s497_s30  ;;  %p501_p1 = scmp.lt.u32.totalorder %s497_s30, %s736_s1 }
   0x7   :  { %p503_p2 = pnand %p501_p1, %p498_p0 }
   0x9   :  { %506 = shalt.err (!%p503_p2)
}
   0xa   :  { %s507_s12 = scalar_lea.vmem %s33_s25, 1024  ;;  %p512_p4 = scmp.lt.s32.totalorder %s33_s25, %s33_s25 }
   0xb   :  { %p508_p3 = scmp.ne.s32.totalorder %s33_s25, %s507_s12  ;;  %p513_p5 = scmp.lt.s32.totalorder %s507_s12, %s507_s12 }
   0xd   :  { %p514_p6 = por %p513_p5, %p512_p4 }
   0xf   :  { %p515_p7 = pnand %p514_p6, %p508_p3 }
  0x11   :  { %518 = shalt.err (!%p515_p7)
}
  0x12   :  { %s593_s13 = smov 64   ;;  %s594_s14 = smov 4  }
  0x13   :  { %38 = dma.hbm_to_vmem [thread:$0]  %s736_s1, 1024, %s33_s25, [#allocation7], %s593_s13, %s593_s13, %s594_s14  }
  0x14   :  { %s519_s19 = scalar_lea.hbm %s735_s0, 128 }
  0x15   :  { %p520_p8 = scmp.ne.s32.totalorder %s735_s0, %s519_s19  ;;  %p523_p9 = scmp.lt.u32.totalorder %s519_s19, %s735_s0 }
  0x17   :  { %p525_p10 = pnand %p523_p9, %p520_p8 }
  0x19   :  { %528 = shalt.err (!%p525_p10)
}
  0x1a   :  { %s529_s24 = scalar_lea.vmem %s641_s27, 128  ;;  %p534_p12 = scmp.lt.s32.totalorder %s641_s27, %s641_s27 }
  0x1b   :  { %p530_p11 = scmp.ne.s32.totalorder %s641_s27, %s529_s24  ;;  %p535_p13 = scmp.lt.s32.totalorder %s529_s24, %s529_s24 }
  0x1d   :  { %p536_p0 = por %p535_p13, %p534_p12 }
  0x1f   :  { %p537_p1 = pnand %p536_p0, %p530_p11 }
  0x21   :  { %540 = shalt.err (!%p537_p1)
}
  0x22   :  { %26 = dma.hbm_to_vmem [thread:$0]  %s735_s0, 128, %s641_s27, [#allocation4], %s593_s13, %s593_s13, %s594_s14  }
  0x23   :  { %s595_s26 = smov [#allocation8]   ;;  %s541_s8 = scalar_lea.hbm %s740_s5, 1024 }
  0x24   :  { %s50_s28 = sshll.u32 %s595_s26, 4  ;;  %p542_p2 = scmp.ne.s32.totalorder %s740_s5, %s541_s8  ;;  %s51_s28 = int_to_ptr.vmem [resolvable:$true] %s50_s28 }
  0x25   :  { %p545_p3 = scmp.lt.u32.totalorder %s541_s8, %s740_s5 }
  0x27   :  { %p547_p4 = pnand %p545_p3, %p542_p2 }
  0x29   :  { %550 = shalt.err (!%p547_p4)
}
  0x2a   :  { %s551_s15 = scalar_lea.vmem %s51_s28, 1024  ;;  %p556_p6 = scmp.lt.s32.totalorder %s51_s28, %s51_s28 }
  0x2b   :  { %p552_p5 = scmp.ne.s32.totalorder %s51_s28, %s551_s15  ;;  %p557_p7 = scmp.lt.s32.totalorder %s551_s15, %s551_s15 }
  0x2d   :  { %p558_p8 = por %p557_p7, %p556_p6 }
  0x2f   :  { %p559_p9 = pnand %p558_p8, %p552_p5 }
  0x31   :  { %562 = shalt.err (!%p559_p9)
}
  0x32   :  { %56 = dma.hbm_to_vmem [thread:$0]  %s740_s5, 1024, %s51_s28, [#allocation7], %s593_s13, %s593_s13, %s594_s14  }
  0x33   :  { %585 = dma.done.wait [#allocation4], 128  }
  0x34   :  { %586 = vsyncadd [#allocation4], 4294967168 }
  0x35   :  { %587 = dma.done.wait [#allocation7], 2048  }
  0x36   :  { %588 = vsyncadd [#allocation7], 4294965248  ;;  %v596_v0 = vmov 0.0   ;;  %vm597_vm0 = vmmov 0   ;;  %v472_v1 = vld [vmem:[#allocation6] sm:$0xff]   ;;  %v473_v2 = vld [vmem:[#allocation6 + $0x8] sm:$0xff]   ;;  %v211_v28 = vlaneseq }
  0x37   :  { %422 = vmatprep.subr.bf16.mxu0 %v596_v0  ;;  %438 = vmatprep.mubr.msk.bf16.mxu0 %vm597_vm0, %v596_v0  ;;  %v474_v3 = vld [vmem:[#allocation6 + $0x10] sm:$0xff]   ;;  %v475_v4 = vld [vmem:[#allocation6 + $0x18] sm:$0xff]   ;;  %v476_v5 = vld [vmem:[#allocation6 + $0x20] sm:$0xff]   ;;  %s598_s20 = smov [#allocation9]  }
  0x38   :  { %442 = vmatprep.subr.bf16.mxu1 %v596_v0  ;;  %458 = vmatprep.mubr.msk.bf16.mxu1 %vm597_vm0, %v596_v0  ;;  %v477_v6 = vld [vmem:[#allocation6 + $0x28] sm:$0xff]   ;;  %v478_v7 = vld [vmem:[#allocation6 + $0x30] sm:$0xff]   ;;  %v479_v8 = vld [vmem:[#allocation6 + $0x38] sm:$0xff]   ;;  %v212_v29 = vand.u32 127, %v211_v28  ;;  %s370_s21 = sshll.u32 %s598_s20, 4  ;;  %s371_s21 = int_to_ptr.vmem [resolvable:$true] %s370_s21 }
  0x39   :  { %423 = vmatpush3.bf16.msra.mxu0 %v472_v1  ;;  %v480_v9 = vld [vmem:[#allocation3] sm:$0xff]   ;;  %v481_v27 = vld [vmem:[#allocation8] sm:$0xff]   ;;  %v482_v40 = vld [vmem:[#allocation8 + $0x8] sm:$0xff]   ;;  %p568_p11 = scmp.lt.s32.totalorder %s371_s21, %s371_s21 }
  0x3a   :  { %424 = vmatprep.subr.bf16.mxu0 %v596_v0  ;;  %v383_v10 = vld [vmem:[%s737_s2] ss:$0 sm:$0xff]  ;;  %443 = vmatpush3.bf16.msra.mxu1 %v481_v27  ;;  %vm213_vm1 = vcmp.lt.s32.totalorder %v212_v29, 32  ;;  %v483_v41 = vld [vmem:[#allocation8 + $0x10] sm:$0xff]   ;;  %v485_v43 = vld [vmem:[#allocation8 + $0x20] sm:$0xff]  }
  0x3b   :  { %444 = vmatprep.subr.bf16.mxu1 %v596_v0  ;;  %v484_v42 = vld [vmem:[#allocation8 + $0x18] sm:$0xff]   ;;  %v486_v44 = vld [vmem:[#allocation8 + $0x28] sm:$0xff]   ;;  %v487_v45 = vld [vmem:[#allocation8 + $0x30] sm:$0xff]  }
  0x3c   :  { %v488_v46 = vld [vmem:[#allocation8 + $0x38] sm:$0xff]  }
  0x3d   :  { %425 = vmatpush3.bf16.msra.mxu0 %v473_v2  ;;  %v393_v55 = vld [vmem:[%s738_s3] ss:$0 sm:$0xff]  ;;  %s563_s3 = scalar_lea.vmem %s371_s21, 256 }
  0x3e   :  { %426 = vmatprep.subr.bf16.mxu0 %v596_v0  ;;  %445 = vmatpush3.bf16.msra.mxu1 %v482_v40  ;;  %v394_v59 = vld [vmem:[%s739_s4] ss:$0 sm:$0xff]  ;;  %p564_p10 = scmp.ne.s32.totalorder %s371_s21, %s563_s3  ;;  %p569_p12 = scmp.lt.s32.totalorder %s563_s3, %s563_s3 }
  0x3f   :  { %446 = vmatprep.subr.bf16.mxu1 %v596_v0 }
  0x40   :  { %p570_p13 = por %p569_p12, %p568_p11 }
  0x41   :  { %427 = vmatpush3.bf16.msra.mxu0 %v474_v3 }
  0x42   :  { %428 = vmatprep.subr.bf16.mxu0 %v596_v0  ;;  %447 = vmatpush3.bf16.msra.mxu1 %v483_v41  ;;  %p571_p0 = pnand %p570_p13, %p564_p10 }
  0x43   :  { %448 = vmatprep.subr.bf16.mxu1 %v596_v0 }
  0x45   :  { %429 = vmatpush3.bf16.msra.mxu0 %v475_v4 }
  0x46   :  { %430 = vmatprep.subr.bf16.mxu0 %v596_v0  ;;  %449 = vmatpush3.bf16.msra.mxu1 %v484_v42 }
  0x47   :  { %450 = vmatprep.subr.bf16.mxu1 %v596_v0 }
  0x49   :  { %431 = vmatpush3.bf16.msra.mxu0 %v476_v5 }
  0x4a   :  { %432 = vmatprep.subr.bf16.mxu0 %v596_v0  ;;  %451 = vmatpush3.bf16.msra.mxu1 %v485_v43 }
  0x4b   :  { %452 = vmatprep.subr.bf16.mxu1 %v596_v0 }
  0x4d   :  { %433 = vmatpush3.bf16.msra.mxu0 %v477_v6 }
  0x4e   :  { %434 = vmatprep.subr.bf16.mxu0 %v596_v0  ;;  %453 = vmatpush3.bf16.msra.mxu1 %v486_v44 }
  0x4f   :  { %454 = vmatprep.subr.bf16.mxu1 %v596_v0 }
  0x51   :  { %435 = vmatpush3.bf16.msra.mxu0 %v478_v7 }
  0x52   :  { %436 = vmatprep.subr.bf16.mxu0 %v596_v0  ;;  %455 = vmatpush3.bf16.msra.mxu1 %v487_v45 }
  0x53   :  { %456 = vmatprep.subr.bf16.mxu1 %v596_v0  ;;  %v395_v0 = vld [vmem:[%s741_s6] ss:$0 sm:$0xff] }
  0x55   :  { %437 = vmatpush3.bf16.msra.mxu0 %v479_v8 }
  0x56   :  { %457 = vmatpush3.bf16.msra.mxu1 %v488_v46 }
  0x58   :  { %439 = vmatmul.mubr.bf16.vlgmr.msra.gmra.mrb[0].mxu0 %v480_v9 }
 0x12b   :  { %v186_v11 = vpop.f32.mrb[0].mxu0 }
 0x12c   :  { %v187_v12 = vadd.f32 %v383_v10, %v186_v11  ;;  %v440_v13 = vpop.f32.mrb[1].mxu0 }
 0x12d   :  { %v189_v14 = vpop.f32.mrb[2].mxu0 }
 0x12e   :  { %v195_v15 = vmul.f32 0.70710677, %v187_v12  ;;  %v190_v16 = vadd.f32 %v383_v10, %v189_v14  ;;  %v441_v17 = vpop.f32.mrb[3].mxu0  ;;  %v193_v20 = vmul.f32 0.5, %v187_v12 }
 0x130   :  { %489 = verf.f32 %v195_v15  ;;  %v196_v18 = vmul.f32 0.70710677, %v190_v16  ;;  %v194_v25 = vmul.f32 0.5, %v190_v16 }
 0x132   :  { %491 = verf.f32 %v196_v18 }
 0x13a   :  { %v490_v19 = vpop.eup %489 }
 0x13b   :  { %v199_v21 = vadd.f32 1.0, %v490_v19 }
 0x13c   :  { %v492_v22 = vpop.eup %491 }
 0x13d   :  { %v201_v23 = vmul.f32 %v199_v21, %v193_v20  ;;  %v200_v24 = vadd.f32 1.0, %v492_v22 }
 0x13f   :  { %203 = vadd.xlane.f32.xlu0 %v201_v23  ;;  %v202_v26 = vmul.f32 %v200_v24, %v194_v25 }
 0x143   :  { %205 = vadd.xlane.f32.xlu0 %v202_v26 }
 0x1cc   :  { %v204_v30 = vpop.xlane.xlu0 %203 }
 0x1cd   :  { %v207_v31 = vmul.f32 0.03125, %v204_v30 }
 0x1cf   :  { %v209_v32 = vsub.f32 %v201_v23, %v207_v31 }
 0x1d0   :  { %v206_v33 = vpop.xlane.xlu0 %205 }
 0x1d1   :  { %v208_v34 = vmul.f32 0.03125, %v206_v33  ;;  %v214_v35 = vsel %vm213_vm1, %v209_v32, 0.0 }
 0x1d2   :  { %v216_v36 = vmul.f32 %v214_v35, %v214_v35 }
 0x1d3   :  { %v210_v37 = vsub.f32 %v202_v26, %v208_v34 }
 0x1d4   :  { %218 = vadd.xlane.f32.xlu1 %v216_v36 }
 0x1d5   :  { %v215_v38 = vsel %vm213_vm1, %v210_v37, 0.0 }
 0x1d6   :  { %v217_v39 = vmul.f32 %v215_v38, %v215_v38 }
 0x1d8   :  { %220 = vadd.xlane.f32.xlu1 %v217_v39 }
 0x261   :  { %v219_v47 = vpop.xlane.xlu1 %218 }
 0x262   :  { %v222_v48 = vmul.f32 0.03125, %v219_v47 }
 0x264   :  { %v224_v49 = vadd.f32 1e-05, %v222_v48 }
 0x265   :  { %v221_v50 = vpop.xlane.xlu1 %220 }
 0x266   :  { %493 = vrsqrt.f32 %v224_v49  ;;  %v223_v51 = vmul.f32 0.03125, %v221_v50 }
 0x268   :  { %v225_v52 = vadd.f32 1e-05, %v223_v51 }
 0x26a   :  { %495 = vrsqrt.f32 %v225_v52 }
 0x270   :  { %v494_v53 = vpop.eup %493 }
 0x271   :  { %v228_v54 = vmul.f32 %v494_v53, %v214_v35 }
 0x273   :  { %v237_v58 = vmul.f32 %v393_v55, %v228_v54 }
 0x274   :  { %v496_v56 = vpop.eup %495 }
 0x275   :  { %v229_v57 = vmul.f32 %v496_v56, %v215_v38  ;;  %v246_v61 = vadd.f32 %v394_v59, %v237_v58 }
 0x277   :  { %v238_v60 = vmul.f32 %v393_v55, %v229_v57 }
 0x279   :  { %v247_v62 = vadd.f32 %v394_v59, %v238_v60 }
 0x27b   :  { %v248_v63 = vpack.c.bf16 %v247_v62, %v246_v61 }
 0x27d   :  { %459 = vmatmul.mubr.bf16.vlgmr.msra.gmra.mrb[0].mxu1 %v248_v63 }
 0x350   :  { %v356_v1 = vpop.f32.mrb[0].mxu1 }
 0x351   :  { %v357_v2 = vadd.f32 %v395_v0, %v356_v1  ;;  %v460_v3 = vpop.f32.mrb[1].mxu1 }
 0x352   :  { %v359_v4 = vpop.f32.mrb[2].mxu1 }
 0x353   :  { %363 = vst [vmem:[#allocation9] sm:$0xff] %v357_v2  ;;  %v360_v5 = vadd.f32 %v395_v0, %v359_v4  ;;  %v461_v6 = vpop.f32.mrb[3].mxu1 }
 0x355   :  { %364 = vst [vmem:[#allocation9 + $0x8] sm:$0xff] %v360_v5 }
 0x356   :  { %574 = shalt.err (!%p571_p0)
}
 0x357   :  { %s575_s22 = scalar_lea.hbm %s742_s7, 256 }
 0x358   :  { %p576_p1 = scmp.ne.s32.totalorder %s742_s7, %s575_s22  ;;  %p579_p2 = scmp.lt.u32.totalorder %s575_s22, %s742_s7 }
 0x35a   :  { %p581_p3 = pnand %p579_p2, %p576_p1 }
 0x35c   :  { %584 = shalt.err (!%p581_p3)
}
 0x35d   :  { %s599_s26 = smov 128   ;;  %s600_s28 = smov 8  }
 0x35e   :  { %376 = dma.vmem_to_hbm [thread:$0]  %s371_s21, 256, %s742_s7, [#allocation5], %s599_s26, %s599_s26, %s600_s28  }
 0x35f   :  { %589 = dma.done.wait [#allocation5], 256  }
 0x360   :  { %590 = vsyncadd [#allocation5], 4294967040 }
 0x361   :  { %380 = vsyncpa [#allocation4], 1 }
 0x362   :  { %381 = vsyncpa [#allocation7], 1 }
 0x363   :  { %382 = vsyncpa [#allocation5], 1 }

</bundles_post_ra>
